<compile_context>
chip_gen: v6e
topology: v6e:2x2x1
jax: 0.10.0
libtpu: 0.0.40
codegen_flags: <defaults>
</compile_context>

<pallas_src>
import functools

import jax
import jax.numpy as jnp
import numpy as np
from jax.experimental import pallas as pl
from jax.experimental.pallas import tpu as pltpu

_MB = 1024 * 1024


# ---------------------------------------------------------------------------
# Kernels
# ---------------------------------------------------------------------------
def _fullk_kernel(e_sel_ref, zflag_ref,          # SMEM scalar prefetch ([N] each)
                  x_ref, w_ref, b_ref, m_ref,    # VMEM input tiles
                  out_ref):                      # VMEM output tile (bf16)
    """One (embedder, M-tile) step: full-K matmul + fused epilogue + store."""
    e = pl.program_id(0)

    @pl.when(zflag_ref[e] == 0)
    def _():
        acc = jnp.dot(x_ref[0].astype(jnp.bfloat16), w_ref[0],
                      preferred_element_type=jnp.float32)
        # m_ref carries ucg_mask * scale_factor**(N-e) * (not forced), per row.
        out_ref[...] = ((acc + b_ref[0]) * m_ref[0]).astype(out_ref.dtype)

    @pl.when(zflag_ref[e] != 0)
    def _():
        out_ref[...] = jnp.zeros_like(out_ref)


def _ktiled_kernel(e_sel_ref, zflag_ref,
                   x_ref, w_ref, b_ref, m_ref,
                   out_ref, acc_ref):
    """Fallback for very large D_in: K-tiled reduction with f32 accumulator."""
    e = pl.program_id(0)
    k = pl.program_id(2)
    nk = pl.num_programs(2)

    @pl.when(k == 0)
    def _():
        acc_ref[...] = jnp.zeros_like(acc_ref)

    @pl.when(zflag_ref[e] == 0)
    def _():
        acc_ref[...] += jnp.dot(x_ref[0].astype(jnp.bfloat16), w_ref[0],
                                preferred_element_type=jnp.float32)

    @pl.when(k == nk - 1)
    def _():
        out_ref[...] = ((acc_ref[...] + b_ref[0]) * m_ref[0]).astype(out_ref.dtype)


# ---------------------------------------------------------------------------
# VMEM budgeting helpers (double-buffered estimates)
# ---------------------------------------------------------------------------
def _vmem_capacity_bytes():
    try:
        return int(pltpu.get_tpu_info().vmem_capacity_bytes)
    except Exception:
        return 64 * _MB     # conservative default (v7x per-TC VMEM)


def _est_fullk(tm, d_in, d_out):
    return (2 * tm * d_in * 4        # x tile (f32), double-buffered
            + 2 * d_in * d_out * 2   # W (bf16), double-buffered
            + 2 * tm * d_out * 2     # out tile (bf16), double-buffered
            + 2 * tm * 4 + 2 * d_out * 4)


def _est_ktiled(tm, tk, d_out):
    return (2 * tm * tk * 4 + 2 * tk * d_out * 2 + 2 * tm * d_out * 2
            + tm * d_out * 4        # f32 accumulator scratch
            + 2 * tm * 4 + 2 * d_out * 4)


# ---------------------------------------------------------------------------
# Wrapper
# ---------------------------------------------------------------------------
@functools.partial(jax.jit, static_argnames=("scale_factor", "out_dtype"))
def latent_conditioner_forward(xs, ws, bs, ucg_mask, force_zero,
                               scale_factor, out_dtype=jnp.bfloat16):
    """Fused LatentConditioner forward over N linear embedders.

    xs:         [N, B, S, D_in]   per-embedder inputs (batch[key_e])
    ws:         [N, D_in, D_out]  per-embedder weights
    bs:         [N, D_out]        per-embedder biases
    ucg_mask:   [N, B]            Bernoulli keep mask (1 = keep, 0 = drop)
    force_zero: [N]               int/bool, zero this embedder's slice
    Returns:    [B, S, N*D_out]   == output['crossattn'] of the torch module
    """
    n_emb, bsz, seq, d_in = xs.shape
    d_out = ws.shape[-1]
    assert ws.shape == (n_emb, d_in, d_out)
    assert bs.shape == (n_emb, d_out)
    assert d_out % 128 == 0, "per-embedder D_out must be a multiple of 128"
    # TODO(synk): pack/pad embedders with D_out < 128 into the output slab.

    m = bsz * seq

    # ---- host-side constant folding (all tiny arrays) ----------------------
    # Running-concat scaling: slice e is scaled by scale_factor**(N-e).
    scales = jnp.asarray([float(scale_factor) ** (n_emb - e) for e in range(n_emb)],
                         dtype=jnp.float32)
    zflag = jnp.asarray(force_zero, dtype=jnp.int32)
    # Per-row factor = ucg keep mask * scale * (not force-zero); (acc+b)*0 == 0.
    factor_nb = (ucg_mask.astype(jnp.float32)
                 * (1.0 - zflag.astype(jnp.float32))[:, None]
                 * scales[:, None])                                  # [N, B]
    row_mask = jnp.broadcast_to(factor_nb[:, :, None], (n_emb, bsz, seq))
    row_mask = row_mask.reshape(n_emb, m, 1)                         # [N, M, 1]

    # Redirect table: force-zero embedders point their X/W index_maps at the
    # most recent non-forced embedder, so no new DMA is issued for them.
    idx = jnp.arange(n_emb, dtype=jnp.int32)
    cand = jnp.where(zflag == 0, idx, jnp.int32(-1))
    e_sel = jnp.maximum(jax.lax.cummax(cand, axis=0), 0).astype(jnp.int32)

    x2 = xs.reshape(n_emb, m, d_in)           # f32 straight from HBM; cast in-kernel
    w2 = ws.astype(jnp.bfloat16)              # pre-cast once (small, MXU operand)
    b3 = bs.astype(jnp.float32)[:, None, :]   # [N, 1, D_out]

    vmem_cap = _vmem_capacity_bytes()
    tile_budget = max(16 * _MB, vmem_cap // 2 - 8 * _MB)

    out_shape = jax.ShapeDtypeStruct((m, n_emb * d_out), out_dtype)

    # ---- main path: full-K per tile, W resident per embedder, no scratch ---
    tm = None
    for cand_tm in ([c for c in (1024, 512, 256, 128, 64, 32, 16) if c <= m] or [m]):
        if _est_fullk(cand_tm, d_in, d_out) <= tile_budget:
            tm = cand_tm
            break

    if tm is not None:
        est = _est_fullk(tm, d_in, d_out)
        grid = (n_emb, pl.cdiv(m, tm))
        # index_maps receive the scalar-prefetch refs as trailing positional args.
        x_spec = pl.BlockSpec((1, tm, d_in),
                              lambda e, i, es, zf: (es[e], i * (1 - zf[e]), 0))
        w_spec = pl.BlockSpec((1, d_in, d_out),
                              lambda e, i, es, zf: (es[e], 0, 0))
        b_spec = pl.BlockSpec((1, 1, d_out), lambda e, i, es, zf: (e, 0, 0))
        m_spec = pl.BlockSpec((1, tm, 1), lambda e, i, es, zf: (e, i, 0))
        o_spec = pl.BlockSpec((tm, d_out), lambda e, i, es, zf: (i, e))
        # TODO(synk): on VMEM-rich parts (v5e/v6e, 128 MiB) spend headroom on
        # pipeline_mode=pl.Buffered(3) for x_spec and/or tm=1024.
        out = pl.pallas_call(
            _fullk_kernel,
            out_shape=out_shape,
            grid_spec=pltpu.PrefetchScalarGridSpec(
                num_scalar_prefetch=2,
                grid=grid,
                in_specs=[x_spec, w_spec, b_spec, m_spec],
                out_specs=o_spec,
            ),
            compiler_params=pltpu.CompilerParams(
                # Embedder axis "arbitrary" so megacore splits over M tiles
                # (balanced on v7x even with few embedders).
                dimension_semantics=("arbitrary", "parallel"),
                vmem_limit_bytes=min(vmem_cap * 3 // 4,
                                     max(32 * _MB, est + 16 * _MB)),
            ),
        )(e_sel, zflag, x2, w2, b3, row_mask)
    else:
        # ---- fallback: K-tiled reduction (very large D_in) ------------------
        tm_f, tk_f = None, None
        for cand_tm in ([c for c in (512, 256, 128, 64, 32, 16) if c <= m] or [m]):
            for cand_tk in (2048, 1024, 512, 256, 128):
                if _est_ktiled(cand_tm, cand_tk, d_out) <= tile_budget:
                    tm_f, tk_f = cand_tm, cand_tk
                    break
            if tm_f is not None:
                break
        if tm_f is None:
            tm_f, tk_f = (16 if m >= 16 else m), 128
        # TODO(synk): also tile D_out (output columns) for very large D_out.
        k_pad = (-d_in) % tk_f
        x_f = x2 if k_pad == 0 else jnp.pad(x2, ((0, 0), (0, 0), (0, k_pad)))
        w_f = w2 if k_pad == 0 else jnp.pad(w2, ((0, 0), (0, k_pad), (0, 0)))
        k_t = d_in + k_pad
        est = _est_ktiled(tm_f, tk_f, d_out)
        grid = (n_emb, pl.cdiv(m, tm_f), k_t // tk_f)
        # TODO(synk): keep W_e fully resident (index (e,0,0)) when W alone fits
        # VMEM, instead of re-streaming its K tiles once per M tile.
        x_spec = pl.BlockSpec((1, tm_f, tk_f), lambda e, i, k, *_: (e, i, k))
        w_spec = pl.BlockSpec((1, tk_f, d_out), lambda e, i, k, *_: (e, k, 0))
        b_spec = pl.BlockSpec((1, 1, d_out), lambda e, i, k, *_: (e, 0, 0))
        m_spec = pl.BlockSpec((1, tm_f, 1), lambda e, i, k, *_: (e, i, 0))
        o_spec = pl.BlockSpec((tm_f, d_out), lambda e, i, k, *_: (i, e))
        out = pl.pallas_call(
            _ktiled_kernel,
            out_shape=out_shape,
            grid_spec=pltpu.PrefetchScalarGridSpec(
                num_scalar_prefetch=2,
                grid=grid,
                in_specs=[x_spec, w_spec, b_spec, m_spec],
                out_specs=o_spec,
                scratch_shapes=[pltpu.VMEM((tm_f, d_out), jnp.float32)],
            ),
            compiler_params=pltpu.CompilerParams(
                dimension_semantics=("arbitrary", "parallel", "arbitrary"),
                vmem_limit_bytes=min(vmem_cap * 3 // 4,
                                     max(32 * _MB, est + 16 * _MB)),
            ),
        )(e_sel, zflag, x_f, w_f, b3, row_mask)

    return out.reshape(bsz, seq, n_emb * d_out)


# ---------------------------------------------------------------------------
# Reference (literal port of the torch loop with running-concat scaling)
# ---------------------------------------------------------------------------
def reference_forward(xs, ws, bs, ucg_mask, force_zero, scale_factor):
    n_emb = xs.shape[0]
    out = None
    for e in range(n_emb):
        emb = jnp.einsum(
            "bsd,df->bsf",
            xs[e].astype(jnp.bfloat16), ws[e].astype(jnp.bfloat16),
            preferred_element_type=jnp.float32,
        ) + bs[e].astype(jnp.float32)
        emb = emb * ucg_mask[e][:, None, None].astype(jnp.float32)
        if bool(force_zero[e]):
            emb = jnp.zeros_like(emb)
        out = emb if out is None else jnp.concatenate([out, emb], axis=2)
        out = out * scale_factor
    return out


if __name__ == "__main__":
    key = jax.random.PRNGKey(0)
    n_emb, bsz, seq, d_in, d_out = 3, 2, 8, 128, 128
    scale_factor = 0.5
    ucg_rates = [0.3, 0.0, 0.5]
    force_zero = np.array([0, 1, 0], dtype=np.int32)   # embedder #1 forced to zero

    kx, kw, kb, km = jax.random.split(key, 4)
    xs = jax.random.normal(kx, (n_emb, bsz, seq, d_in), dtype=jnp.float32)
    ws = jax.random.normal(kw, (n_emb, d_in, d_out), dtype=jnp.float32) / np.sqrt(d_in)
    bs = 0.1 * jax.random.normal(kb, (n_emb, d_out), dtype=jnp.float32)

    # UCG Bernoulli keep mask per (embedder, batch element): keep with prob 1-rate.
    keep_p = jnp.asarray([1.0 - r for r in ucg_rates], dtype=jnp.float32)[:, None]
    ucg_mask = jax.random.bernoulli(km, keep_p, (n_emb, bsz)).astype(jnp.float32)

    out = jax.block_until_ready(
        latent_conditioner_forward(xs, ws, bs, ucg_mask, jnp.asarray(force_zero),
                                   scale_factor))
    ref = jax.block_until_ready(
        reference_forward(xs, ws, bs, ucg_mask, force_zero, scale_factor))

    np.testing.assert_allclose(np.asarray(out.astype(jnp.float32)), np.asarray(ref),
                               rtol=2e-2, atol=2e-2)
    print("KERNEL_OK")
</pallas_src>

<mosaic_0001>
module attributes {stable_mosaic.version = 11 : i64} {
  func.func @_fullk_kernel(%arg0: i32, %arg1: i32, %arg2: memref<3xi32, #tpu.memory_space<smem>>, %arg3: memref<3xi32, #tpu.memory_space<smem>>, %arg4: memref<1x16x128xf32, #tpu.memory_space<vmem>>, %arg5: memref<1x128x128xbf16, #tpu.memory_space<vmem>>, %arg6: memref<1x1x128xf32, #tpu.memory_space<vmem>>, %arg7: memref<1x16x1xf32, #tpu.memory_space<vmem>>, %arg8: memref<16x128xbf16, #tpu.memory_space<vmem>>) attributes {dimension_semantics = [#tpu.dimension_semantics<arbitrary>, #tpu.dimension_semantics<parallel>], iteration_bounds = array<i64: 3, 1>, scalar_prefetch = 2 : i64, scratch_operands = 0 : i64, tpu.core_type = #tpu.core_type<tc>, window_params = [{transform_indices = @transform_0, window_bounds = array<i64: 1, 16, 128>}, {transform_indices = @transform_1, window_bounds = array<i64: 1, 128, 128>}, {transform_indices = @transform_2, window_bounds = array<i64: 1, 1, 128>}, {transform_indices = @transform_3, window_bounds = array<i64: 1, 16, 1>}, {transform_indices = @transform_4, window_bounds = array<i64: 16, 128>}]} {
    %0 = arith.index_cast %arg0 : i32 to index
    %1 = memref.load %arg3[%0] : memref<3xi32, #tpu.memory_space<smem>>
    %c0_i32 = arith.constant 0 : i32
    %2 = arith.cmpi eq, %1, %c0_i32 : i32
    %3 = arith.extui %2 : i1 to i32
    %c0_i32_0 = arith.constant 0 : i32
    %4 = arith.cmpi ne, %3, %c0_i32_0 : i32
    scf.if %4 {
      %c0 = arith.constant 0 : index
      %c0_3 = arith.constant 0 : index
      %c0_4 = arith.constant 0 : index
      %10 = vector.load %arg4[%c0, %c0_3, %c0_4] : memref<1x16x128xf32, #tpu.memory_space<vmem>>, vector<1x16x128xf32>
      %11 = vector.shape_cast %10 : vector<1x16x128xf32> to vector<16x128xf32>
      %12 = arith.truncf %11 : vector<16x128xf32> to vector<16x128xbf16>
      %c0_5 = arith.constant 0 : index
      %c0_6 = arith.constant 0 : index
      %c0_7 = arith.constant 0 : index
      %13 = vector.load %arg5[%c0_5, %c0_6, %c0_7] : memref<1x128x128xbf16, #tpu.memory_space<vmem>>, vector<1x128x128xbf16>
      %14 = vector.shape_cast %13 : vector<1x128x128xbf16> to vector<128x128xbf16>
      %cst = arith.constant dense<0.000000e+00> : vector<16x128xf32>
      %15 = tpu.matmul %12, %14, %cst {dimension_numbers = #tpu.dot_dimension_numbers<[1], [0], [0], [1], [0, 0, 1, 1], [], []>} : vector<16x128xbf16>, vector<128x128xbf16>, vector<16x128xf32> -> vector<16x128xf32>
      %c0_8 = arith.constant 0 : index
      %c0_9 = arith.constant 0 : index
      %c0_10 = arith.constant 0 : index
      %16 = vector.load %arg6[%c0_8, %c0_9, %c0_10] : memref<1x1x128xf32, #tpu.memory_space<vmem>>, vector<1x1x128xf32>
      %17 = vector.shape_cast %16 : vector<1x1x128xf32> to vector<1x128xf32>
      %18 = vector.broadcast %17 : vector<1x128xf32> to vector<16x128xf32>
      %19 = arith.addf %15, %18 : vector<16x128xf32>
      %c0_11 = arith.constant 0 : index
      %c0_12 = arith.constant 0 : index
      %c0_13 = arith.constant 0 : index
      %20 = vector.load %arg7[%c0_11, %c0_12, %c0_13] : memref<1x16x1xf32, #tpu.memory_space<vmem>>, vector<1x16x1xf32>
      %21 = vector.shape_cast %20 : vector<1x16x1xf32> to vector<16x1xf32>
      %22 = vector.broadcast %21 : vector<16x1xf32> to vector<16x128xf32>
      %23 = arith.mulf %19, %22 : vector<16x128xf32>
      %24 = arith.truncf %23 : vector<16x128xf32> to vector<16x128xbf16>
      %c0_14 = arith.constant 0 : index
      %c0_15 = arith.constant 0 : index
      %25 = vector.load %arg8[%c0_14, %c0_15] : memref<16x128xbf16, #tpu.memory_space<vmem>>, vector<16x128xbf16>
      tpu.vector_store %arg8[%c0_14, %c0_15], %24 {strides = array<i32>} : memref<16x128xbf16, #tpu.memory_space<vmem>>, vector<16x128xbf16>,
    } else {
    }
    %5 = arith.index_cast %arg0 : i32 to index
    %6 = memref.load %arg3[%5] : memref<3xi32, #tpu.memory_space<smem>>
    %c0_i32_1 = arith.constant 0 : i32
    %7 = arith.cmpi ne, %6, %c0_i32_1 : i32
    %8 = arith.extui %7 : i1 to i32
    %c0_i32_2 = arith.constant 0 : i32
    %9 = arith.cmpi ne, %8, %c0_i32_2 : i32
    scf.if %9 {
      %cst = arith.constant 0.000000e+00 : bf16
      %10 = vector.broadcast %cst : bf16 to vector<16x128xbf16>
      %c0 = arith.constant 0 : index
      %c0_3 = arith.constant 0 : index
      %11 = vector.load %arg8[%c0, %c0_3] : memref<16x128xbf16, #tpu.memory_space<vmem>>, vector<16x128xbf16>
      tpu.vector_store %arg8[%c0, %c0_3], %10 {strides = array<i32>} : memref<16x128xbf16, #tpu.memory_space<vmem>>, vector<16x128xbf16>,
    } else {
    }
    return
  }
  func.func @transform_0(%arg0: i32, %arg1: i32, %arg2: memref<3xi32, #tpu.memory_space<smem>>, %arg3: memref<3xi32, #tpu.memory_space<smem>>) -> (i32, i32, i32) {
    %0 = arith.index_cast %arg0 : i32 to index
    %1 = memref.load %arg2[%0] : memref<3xi32, #tpu.memory_space<smem>>
    %2 = arith.index_cast %arg0 : i32 to index
    %3 = memref.load %arg3[%2] : memref<3xi32, #tpu.memory_space<smem>>
    %c1_i32 = arith.constant 1 : i32
    %4 = arith.subi %c1_i32, %3 : i32
    %5 = arith.muli %arg1, %4 : i32
    %c0_i32 = arith.constant 0 : i32
    %c0_i32_0 = arith.constant 0 : i32
    return %1, %5, %c0_i32 : i32, i32, i32
  }
  func.func @transform_1(%arg0: i32, %arg1: i32, %arg2: memref<3xi32, #tpu.memory_space<smem>>, %arg3: memref<3xi32, #tpu.memory_space<smem>>) -> (i32, i32, i32) {
    %0 = arith.index_cast %arg0 : i32 to index
    %1 = memref.load %arg2[%0] : memref<3xi32, #tpu.memory_space<smem>>
    %c0_i32 = arith.constant 0 : i32
    %c0_i32_0 = arith.constant 0 : i32
    %c0_i32_1 = arith.constant 0 : i32
    return %1, %c0_i32, %c0_i32_0 : i32, i32, i32
  }
  func.func @transform_2(%arg0: i32, %arg1: i32, %arg2: memref<3xi32, #tpu.memory_space<smem>>, %arg3: memref<3xi32, #tpu.memory_space<smem>>) -> (i32, i32, i32) {
    %c0_i32 = arith.constant 0 : i32
    %c0_i32_0 = arith.constant 0 : i32
    %c0_i32_1 = arith.constant 0 : i32
    return %arg0, %c0_i32, %c0_i32_0 : i32, i32, i32
  }
  func.func @transform_3(%arg0: i32, %arg1: i32, %arg2: memref<3xi32, #tpu.memory_space<smem>>, %arg3: memref<3xi32, #tpu.memory_space<smem>>) -> (i32, i32, i32) {
    %c0_i32 = arith.constant 0 : i32
    %c0_i32_0 = arith.constant 0 : i32
    return %arg0, %arg1, %c0_i32 : i32, i32, i32
  }
  func.func @transform_4(%arg0: i32, %arg1: i32, %arg2: memref<3xi32, #tpu.memory_space<smem>>, %arg3: memref<3xi32, #tpu.memory_space<smem>>) -> (i32, i32) {
    %c0_i32 = arith.constant 0 : i32
    return %arg1, %arg0 : i32, i32
  }
}

</mosaic_0001>

<bundles_post_ra>
// kernel: latent_conditioner_forward.1
= control target key start
LH: loop header
LB: loop body
LE: loop exit
PB: predicated region body
PF: predicated region fallthrough
CT: control target
= control target key end

     0   :  { %s1085_s0 = inlined_call_operand.vmem [shape: s32[3], index: 0, kind: input, shape index: {}]   ;;  %s1086_s2 = inlined_call_operand.vmem [shape: f32[3,16,128], index: 2, kind: input, shape index: {}]   ;;  %s1087_s3 = inlined_call_operand.vmem [shape: bf16[3,128,128], index: 3, kind: input, shape index: {}]   ;;  %s1088_s4 = inlined_call_operand.vmem [shape: f32[3,1,128], index: 4, kind: input, shape index: {}]   ;;  %s1089_s5 = inlined_call_operand.vmem [shape: f32[3,16,1], index: 5, kind: input, shape index: {}]   ;;  %s1090_s6 = inlined_call_operand.hbm [shape: bf16[16,384], index: 6, kind: output, shape index: {}]   ;;  %s1091_s1 = inlined_call_operand.vmem [shape: s32[3], index: 1, kind: input, shape index: {}]  }
   0x1   :  { %s11_s23 = sshll.u32 %s1085_s0, 4  ;;  %s15_s26 = sshll.u32 %s1091_s1, 4  ;;  %s12_s23 = int_to_ptr.vmem [resolvable:$true] %s11_s23  ;;  %s16_s26 = int_to_ptr.vmem [resolvable:$true] %s15_s26 }
   0x2   :  { %s770_s27 = scalar_lea.vmem %s12_s23, 16  ;;  %p775_p1 = scmp.lt.s32.totalorder %s12_s23, %s12_s23 }
   0x3   :  { %p771_p0 = scmp.ne.s32.totalorder %s12_s23, %s770_s27  ;;  %p776_p2 = scmp.lt.s32.totalorder %s770_s27, %s770_s27 }
   0x5   :  { %p777_p3 = por %p776_p2, %p775_p1 }
   0x7   :  { %p778_p4 = pnand %p777_p3, %p771_p0 }
   0x9   :  { %781 = shalt.err (!%p778_p4)  }
   0xa   :  { %s874_s28 = smov [#allocation3]   ;;  %s782_s29 = scalar_lea.vmem %s16_s26, 16 }
   0xb   :  { %14 = dma.vmem_to_smem %s12_s23, 16, %s874_s28, [#allocation2] }
   0xc   :  { %p783_p5 = scmp.ne.s32.totalorder %s16_s26, %s782_s29  ;;  %p787_p6 = scmp.lt.s32.totalorder %s16_s26, %s16_s26 }
   0xd   :  { %p788_p7 = scmp.lt.s32.totalorder %s782_s29, %s782_s29 }
   0xf   :  { %p789_p8 = por %p788_p7, %p787_p6 }
  0x11   :  { %p790_p9 = pnand %p789_p8, %p783_p5 }
  0x13   :  { %793 = shalt.err (!%p790_p9)  }
  0x14   :  { %s875_s0 = smov [#allocation4]  }
  0x15   :  { %18 = dma.vmem_to_smem %s16_s26, 16, %s875_s0, [#allocation2] }
  0x16   :  { %844 = dma.done.wait [#allocation2], 32 }
  0x17   :  { %845 = vsyncadd [#allocation2], 4294967264 }
  0x18   :  { %20 = sfence }
  0x19   :  { %21 = vsyncpa [#allocation6], 0 }
  0x1a   :  { %23 = vsyncpa [#allocation6 + $0x1], 0  ;;  %s925_s1 = smov 0   ;;  %s927_s30 = smov 0  }
  0x1b   :  { %s929_s7 = smov 0   ;;  %s931_s8 = smov 0  }
  0x1c   :  { %s933_s9 = smov 0   ;;  %s935_s10 = smov 0  }
  0x1d LB: > { %1095 = sst [smem:[#allocation9_spill]] %s868_s9  ;;  %s629_s11 = sadd.s32 4294967295, %s872_s10   ;;  %s872_s10 = sphi %s935_s10, %s29_s10   ;;  %s868_s9 = sphi %s933_s9, %s1103_s9   ;;  %s864_s8 = sphi %s931_s8, %s1102_s8   ;;  %s860_s7 = sphi %s929_s7, %s1106_s7   ;;  %s856_s30 = sphi %s927_s30, %s1105_s30   ;;  %s852_s1 = sphi %s925_s1, %s1104_s1  }
  0x1e   : > { %s630_s12 = sadd.s32 4294967294, %s872_s10   ;;  %s41_s13 = sadd.s32 1, %s868_s9 }
  0x1f   : > { %s168_s14 = sadd.s32 1, %s860_s7  ;;  %p43_p10 = scmp.ge.s32.totalorder %s41_s13, 3 }
  0x20   : > { %p178_p11 = scmp.ne.s32.totalorder %s860_s7, %s856_s30  ;;  %p179_p12 = scmp.eq.s32.totalorder %s629_s11, 2 }
  0x21   : > { %p184_p13 = scmp.ne.s32.totalorder %s856_s30, %s852_s1  ;;  %s1108_s13 = smov (%p43_p10, %s41_s13), 0 }
  0x22   : > { %1096 = sst [smem:[#allocation10_spill]] %s1108_s13  ;;  %p965_p0 = por %p179_p12, %p178_p11 }
  0x23   : > { %p185_p1 = scmp.eq.s32.totalorder %s630_s12, 2  ;;  %s164_s16 = ssub.s32 %s868_s9, %s1108_s13 }
  0x24   : > { %p633_p2 = scmp.ge.s32.totalorder %s872_s10, 1  ;;  %p166_p3 = scmp.eq.s32.totalorder %s164_s16, 0 }
  0x25   : > { %p972_p4 = por %p185_p1, %p184_p13  ;;  %p253_p5 = scmp.lt.s32.totalorder %s872_s10, 4 }
  0x26   : > { %s978_s18 = scalar_select %p166_p3, %s860_s7, %s168_s14  }
  0x27   : > { %p254_p6 = pnand %p633_p2, %p253_p5 }
  0x28   : > { %1099 = sst [smem:[#allocation11_spill]] %s978_s18  ;;  %s1092_s19 = sand.u32 (!%p254_p6), 1, %s856_s30  }
  0x29   : > { %257 = sbr.rel (%p254_p6) target bundleno = 337 (0x151), region = 36  ;;  %s305_s20 = sld [smem:[#allocation3 + %s864_s8]] (!%p254_p6) }
  0x2a   : > { %s634_s21 = sshll.u32 (!%p254_p6), %s1092_s19, 3  ;;  %s323_s22 = sld [smem:[#allocation3 + %s864_s8]] (!%p254_p6) }
  0x2b   : > { %p330_p7 = scmp.lt.s32.totalorder (!%p254_p6), %s864_s8, 2  ;;  %s345_s23 = sld [smem:[#allocation4 + %s864_s8]] (!%p254_p6) }
  0x2c   : > { %s1008_s26 = scalar_lea.vmem (!%p254_p6), [#allocation5], %s634_s21 }
  0x2e   : > { %s988_s24 = scalar_select %p330_p7, %s864_s8, 2 }
  0x2f   : > { %p310_p8 = scmp.lt.s32.totalorder %s305_s20, 2 }
  0x30   : > { %s332_s27 = scalar_lea.vmem %s1088_s4, %s988_s24  ;;  %p324_p9 = scmp.lt.s32.totalorder %s323_s22, 2 }
  0x31   : > { %s660_s28 = sshll.u32 %s988_s24, 4  ;;  %s1110_s20 = smov (!%p310_p8, %s305_s20), 2 }
  0x32   : > { %s1112_s22 = smov (!%p324_p9, %s323_s22), 2  ;;  %s658_s29 = sshll.u32 %s1110_s20, 4 }
  0x33   : > { %s341_s12 = scalar_lea.vmem %s1089_s5, %s660_s28  ;;  %s1001_s19 = scalar_lea.vmem %s1086_s2, %s658_s29 }
  0x34   : > { %s659_s13 = sshll.u32 %s1112_s22, 6  ;;  %p641_p10 = scmp.ne.s32.totalorder %s345_s23, 0 }
  0x35   : > { %s1006_s25 = scalar_lea.vmem %s1087_s3, %s659_s13 }
  0x36   : > { %349 = sbr.rel (%p641_p10) target bundleno = 296 (0x128), region = 40 }
  0x3b   : > { %v762_v0 = vld [vmem:[%s1006_s25 + $0x38] sm:$0xff]   ;;  %v876_v1 = vmov 0.0   ;;  %v763_v2 = vld [vmem:[%s1006_s25 + $0x30] sm:$0xff]   ;;  %vm877_vm0 = vmmov 0   ;;  %v878_v3 = vmov 0   ;;  %v764_v4 = vld [vmem:[%s1006_s25 + $0x28] sm:$0xff]  }
  0x3c   : > { %677 = vmatprep.subr.bf16.mxu0 %v876_v1  ;;  %693 = vmatprep.mubr.msk.bf16.mxu0 %vm877_vm0, %v876_v1  ;;  %v465_v5 = vld [vmem:[%s341_s12] sm:$0xff]  ;;  %v466_v7 = vld [vmem:[%s341_s12 + $0x8] sm:$0xff]  ;;  %v766_v8 = vld [vmem:[%s1006_s25 + $0x18] sm:$0xff]  }
  0x3d   : > { %678 = vmatpush3.bf16.msra.mxu0 %v762_v0  ;;  %761 = vset.pattern.permute.xlu0 %v878_v3  ;;  %v765_v6 = vld [vmem:[%s1006_s25 + $0x20] sm:$0xff]   ;;  %v767_v9 = vld [vmem:[%s1006_s25 + $0x10] sm:$0xff]   ;;  %v768_v10 = vld [vmem:[%s1006_s25 + $0x8] sm:$0xff]  }
  0x3e   : > { %679 = vmatprep.subr.bf16.mxu0 %v876_v1  ;;  %469 = vperm.xlu0 %761, %v465_v5   ;;  %v769_v11 = vld [vmem:[%s1006_s25] sm:$0xff]   ;;  %v351_v13 = vld [vmem:[%s1001_s19 + $0x8] sm:$0xff] }
  0x3f   : > { %v350_v12 = vld [vmem:[%s1001_s19] sm:$0xff] }
  0x40   : > { %v352_v14 = vpack.c.bf16 %v351_v13, %v350_v12  ;;  %v642_v16 = vld [vmem:[%s332_s27] ss:$0 sm:$0xff] }
  0x41   : > { %680 = vmatpush3.bf16.msra.mxu0 %v763_v2 }
  0x42   : > { %681 = vmatprep.subr.bf16.mxu0 %v876_v1  ;;  %474 = vperm.xlu0 %761, %v466_v7  }
  0x45   : > { %682 = vmatpush3.bf16.msra.mxu0 %v764_v4 }
  0x46   : > { %683 = vmatprep.subr.bf16.mxu0 %v876_v1 }
  0x49   : > { %684 = vmatpush3.bf16.msra.mxu0 %v765_v6 }
  0x4a   : > { %685 = vmatprep.subr.bf16.mxu0 %v876_v1 }
  0x4d   : > { %686 = vmatpush3.bf16.msra.mxu0 %v766_v8 }
  0x4e   : > { %687 = vmatprep.subr.bf16.mxu0 %v876_v1 }
  0x51   : > { %688 = vmatpush3.bf16.msra.mxu0 %v767_v9 }
  0x52   : > { %689 = vmatprep.subr.bf16.mxu0 %v876_v1 }
  0x55   : > { %690 = vmatpush3.bf16.msra.mxu0 %v768_v10 }
  0x56   : > { %691 = vmatprep.subr.bf16.mxu0 %v876_v1 }
  0x59   : > { %692 = vmatpush3.bf16.msra.mxu0 %v769_v11 }
  0x5c   : > { %694 = vmatmul.mubr.bf16.vlgmr.msra.gmra.mxu0 %v352_v14 }
  0xb9   : > { %v470_v15 = vpop.permute.xlu0 %469 }
  0xbd   : > { %v475_v22 = vpop.permute.xlu0 %474 }
 0x11c   : > { %v458_v17 = vpop.f32.mrf.mxu0 }
 0x11d   : > { %v459_v19 = vadd.f32 %v642_v16, %v458_v17 }
 0x11e   : > { %v695_v18 = vpop.f32.mrf.mxu0 }
 0x11f   : > { %v477_v24 = vmul.f32 %v470_v15, %v459_v19 }
 0x120   : > { %v461_v20 = vpop.f32.mrf.mxu0 }
 0x121   : > { %v462_v21 = vadd.f32 %v642_v16, %v461_v20 }
 0x122   : > { %v696_v23 = vpop.f32.mrf.mxu0 }
 0x123   : > { %v478_v25 = vmul.f32 %v475_v22, %v462_v21 }
 0x125   : > { %v666_v26 = vpack.c.bf16 %v478_v25, %v477_v24 }
 0x127   : > { %667 = vst [vmem:[%s1008_s26] sm:$0xff] %v666_v26  }
 0x128 PF: > { %s489_s18 = sld [smem:[#allocation4 + %s864_s8]] }
 0x12e   : > { %p653_p11 = scmp.eq.s32.totalorder %s489_s18, 0 }
 0x130   : > { %493 = sbr.rel (%p653_p11) target bundleno = 311 (0x137), region = 44 }
 0x135   : > { %v879_v27 = vmov 0  }
 0x136   : > { %494 = vst [vmem:[%s1008_s26] sm:$0xf] %v879_v27  ;;  %495 = vst [vmem:[%s1008_s26 + $0x4] sm:$0xf] %v879_v27 }
 0x137 PF: > { %s655_s19 = sshll.u32 %s864_s8, 6  ;;  %s512_s23 = sshll.u32 %s1008_s26, 4  ;;  %s1036_s23 = int_to_ptr.vmem [resolvable:$true] %s512_s23 }
 0x138   : > { %s1033_s22 = scalar_lea.hbm %s1090_s6, %s655_s19  ;;  %s1100_s24 = sand.u32 1, %s856_s30  }
 0x139   : > { %s1040_s27 = scalar_lea.sflag [#allocation6], %s1100_s24  ;;  %s794_s28 = scalar_lea.vmem %s1036_s23, 128 }
 0x13a   : > { %p795_p12 = scmp.ne.s32.totalorder %s1036_s23, %s794_s28  ;;  %s880_s8 = smov [#allocation5]  }
 0x13b   : > { %s798_s29 = sshll.u32 %s880_s8, 4  ;;  %s799_s29 = int_to_ptr.vmem [resolvable:$false] %s798_s29 }
 0x13c   : > { %p796_p13 = pnand %p795_p12, %p965_p0  ;;  %s800_s0 = scalar_lea.vmem %s799_s29, 256 }
 0x13d   : > { %p801_p2 = scmp.lt.s32.totalorder %s1036_s23, %s799_s29  ;;  %p802_p3 = scmp.lt.s32.totalorder %s800_s0, %s794_s28 }
 0x13e   : > { %p797_p1 = pneg %p796_p13 }
 0x13f   : > { %p803_p5 = por %p802_p3, %p801_p2 }
 0x141   : > { %p804_p6 = pnand %p803_p5, %p797_p1 }
 0x143   : > { %807 = shalt.err (!%p804_p6)
}
 0x144   : > { %s808_s11 = scalar_lea.hbm %s1033_s22, 128  ;;  %s812_s16 = scalar_lea.hbm %s1090_s6, 384 }
 0x145   : > { %p809_p7 = scmp.ne.s32.totalorder %s1033_s22, %s808_s11  ;;  %p813_p10 = scmp.lt.s32.totalorder %s1033_s22, %s1090_s6 }
 0x146   : > { %p814_p11 = scmp.lt.s32.totalorder %s812_s16, %s808_s11 }
 0x147   : > { %p810_p8 = pnand %p809_p7, %p965_p0 }
 0x148   : > { %p815_p12 = por %p814_p11, %p813_p10 }
 0x149   : > { %p811_p9 = pneg %p810_p8 }
 0x14b   : > { %p816_p13 = pnand %p815_p12, %p811_p9 }
 0x14d   : > { %819 = shalt.err (!%p816_p13)
}
 0x14e   : > { %s881_s9 = smov 64   ;;  %s882_s13 = smov 192  }
 0x14f   : > { %s883_s18 = smov 4  }
 0x150   : > { %697 = dma.vmem_to_hbm [thread:$0]  (%p965_p0), %s1036_s23, 128, %s1033_s22, %s1040_s27, %s881_s9, %s882_s13, %s883_s18  }
 0x151 PF: > { %p703_p1 = scmp.ge.s32.totalorder %s872_s10, 2  ;;  %s527_s19 = sand.u32 1, %s852_s1  }
 0x152   : > { %s528_s20 = scalar_lea.sflag [#allocation6], %s527_s19 }
 0x153   : > { %p700_p2 = pnand %p703_p1, %p972_p4 }
 0x155   : > { %p701_p3 = pneg %p700_p2 }
 0x157   : > { %847 = dma.done.wait (%p701_p3), %s528_s20, 128  }
 0x158   : > { %849 = vsyncadd (%p701_p3), %s528_s20, 4294967168  ;;  %s29_s10 = sadd.s32 1, %s872_s10   ;;  %s1101_s21 = sld [smem:[#allocation11_spill]] }
 0x159   : > { %p26_p5 = scmp.ge.s32.totalorder %s29_s10, 5   ;;  %s1102_s8 = sld [smem:[#allocation9_spill]] }
 0x15a   : > { %s1103_s9 = sld [smem:[#allocation10_spill]]  ;;  %s1104_s1 = smov %s856_s30 }
 0x15b   : > { %s1105_s30 = smov %s860_s7  ;;  %28 = sbr.rel (!%p26_p5) target bundleno = 29 (0x1d), region = 88 }
 0x15e   : > { %s1106_s7 = smov %s1101_s21 }
 0x160   :  { %533 = vsyncpa [#allocation6], 1 }
 0x161   :  { %535 = vsyncpa [#allocation6 + $0x1], 1 }

</bundles_post_ra>
